<compile_context>
chip_gen: v7x
topology: tpu7x:2x2x1
jax: 0.10.0
libtpu: 0.0.40
codegen_flags: <defaults>
</compile_context>

<pallas_src>
import jax
import jax.numpy as jnp
from jax.experimental import pallas as pl
from jax.experimental.pallas import tpu as pltpu


def _fused_linear_sum_kernel(f_ref, w_ref, b_ref, o_ref):
    # f_ref: (B, tile_n, D) f32  -- streamed feature tile for this row block
    # w_ref: (B, D, C)      f32  -- all branch weights, resident in VMEM
    # b_ref: (1, C)         f32  -- pre-summed bias, resident in VMEM
    # o_ref: (tile_n, C)    f32
    n_branches = f_ref.shape[0]
    acc = jnp.zeros(o_ref.shape, jnp.float32)
    for b in range(n_branches):  # static B (=4) -> unrolled at trace time
        acc = acc + jnp.dot(
            f_ref[b], w_ref[b], preferred_element_type=jnp.float32
        )
    o_ref[...] = acc + b_ref[...]


def _choose_tiling(n_rows, *, target_tile=1024, min_steps=4):
    """Pick (tile_n, num_steps, n_pad).

    num_steps is even and >= min_steps (splits across v7x's 2 TensorCores and
    gives v5e/v6e DMA/compute overlap); tile_n is a multiple of 8 (sublane
    alignment); n_pad = tile_n * num_steps >= n_rows.
    """
    num_steps = max(min_steps, pl.cdiv(n_rows, target_tile))
    num_steps += num_steps % 2  # even -> both v7x TensorCores get work
    tile_n = max(8, ((pl.cdiv(n_rows, num_steps) + 7) // 8) * 8)
    n_pad = tile_n * num_steps
    return tile_n, num_steps, n_pad


def our_model_forward(feats, weights, biases, *, tile_n=None):
    """feats: (B, N, D) f32, weights: (B, D, C) f32, biases: (B, C) f32 -> (N, C) f32.

    Computes sum_b (feats[b] @ weights[b] + biases[b]) — the OurModel forward.
    """
    B, N, D = feats.shape
    C = weights.shape[-1]

    if tile_n is None:
        tile_n, num_steps, n_pad = _choose_tiling(N)
    else:
        assert tile_n % 8 == 0, "tile_n must be 8-aligned (sublane quantum)"
        num_steps = pl.cdiv(N, tile_n)
        n_pad = tile_n * num_steps

    # Pad rows (zeros contribute only the bias to padded output rows, which we
    # slice off below).  No-op when N already tiles exactly.
    if n_pad != N:
        feats = jnp.pad(feats, ((0, 0), (0, n_pad - N), (0, 0)))

    # torch.stack(out).sum(0) adds the four biases once per row -> pre-sum.
    b_sum = jnp.sum(biases.astype(jnp.float32), axis=0).reshape(1, C)

    out = pl.pallas_call(
        _fused_linear_sum_kernel,
        out_shape=jax.ShapeDtypeStruct((n_pad, C), jnp.float32),
        grid_spec=pltpu.PrefetchScalarGridSpec(
            num_scalar_prefetch=0,
            grid=(num_steps,),
            in_specs=[
                # Streamed row tile of all 4 feature matrices (last dim = D,
                # full extent, so the (8,128) rule is satisfied).
                pl.BlockSpec((B, tile_n, D), lambda i: (0, i, 0)),
                # Weights & bias: constant index_map -> resident, no re-DMA.
                pl.BlockSpec((B, D, C), lambda i: (0, 0, 0)),
                pl.BlockSpec((1, C), lambda i: (0, 0)),
            ],
            out_specs=pl.BlockSpec((tile_n, C), lambda i: (i, 0)),
        ),
        compiler_params=pltpu.CompilerParams(
            dimension_semantics=("parallel",),
        ),
    )(feats, weights, b_sum)

    return out[:N] if n_pad != N else out


def _l2_normalize_rows(x, eps=1e-12):
    # matches torch.nn.functional.normalize(x, p=2, dim=1)
    n = jnp.sqrt(jnp.sum(x * x, axis=1, keepdims=True))
    return x / jnp.maximum(n, eps)


if __name__ == "__main__":
    # Small shapes consistent with the module: N nodes, D reduced feature dim
    # (struct_x.shape[1] == x.shape[1] == l_x[i].shape[1]), C classes.
    # B = 4 linear branches: lin1, lin2, linears[0], linears[1].
    N, D, C = 512, 32, 8
    B = 4

    key = jax.random.PRNGKey(0)
    k_feat, k_w, k_b = jax.random.split(key, 3)

    # Synthetic replacements for struct_x, self.x, l_x[0], l_x[1]
    # (each row-L2-normalized as in preprocess()).
    raw = jax.random.normal(k_feat, (B, N, D), dtype=jnp.float32)
    feats = jnp.stack([_l2_normalize_rows(raw[i]) for i in range(B)], axis=0)

    # Deterministic Linear(D, C) params (PyTorch default uniform(-1/sqrt(D), 1/sqrt(D))),
    # stored already transposed to (D, C) so the kernel computes x @ W + b.
    bound = 1.0 / jnp.sqrt(jnp.float32(D))
    weights = jax.random.uniform(
        k_w, (B, D, C), dtype=jnp.float32, minval=-bound, maxval=bound
    )
    biases = jax.random.uniform(
        k_b, (B, C), dtype=jnp.float32, minval=-bound, maxval=bound
    )

    out = our_model_forward(feats, weights, biases)
    out = jax.block_until_ready(out)

    # Pure-JAX f32 reference: torch.stack([lin_k(feat_k) for k]).sum(0).
    ref = (
        jnp.einsum("bnd,bdc->nc", feats, weights)
        + jnp.sum(biases, axis=0)[None, :]
    )
    assert out.shape == (N, C)
    assert jnp.allclose(out, ref, atol=2e-3, rtol=2e-3), "mismatch vs reference"

    print("KERNEL_OK")
</pallas_src>

<mosaic_0001>
module attributes {stable_mosaic.version = 11 : i64} {
  func.func @_fused_linear_sum_kernel(%arg0: i32, %arg1: memref<4x128x32xf32, #tpu.memory_space<vmem>>, %arg2: memref<4x32x8xf32, #tpu.memory_space<vmem>>, %arg3: memref<1x8xf32, #tpu.memory_space<vmem>>, %arg4: memref<128x8xf32, #tpu.memory_space<vmem>>) attributes {dimension_semantics = [#tpu.dimension_semantics<parallel>], iteration_bounds = array<i64: 4>, scalar_prefetch = 0 : i64, scratch_operands = 0 : i64, tpu.core_type = #tpu.core_type<tc>, window_params = [{transform_indices = @transform_0, window_bounds = array<i64: 4, 128, 32>}, {pipeline_mode = #tpu.pipeline_mode<synchronous>, transform_indices = @transform_1, window_bounds = array<i64: 4, 32, 8>}, {pipeline_mode = #tpu.pipeline_mode<synchronous>, transform_indices = @transform_2, window_bounds = array<i64: 1, 8>}, {transform_indices = @transform_3, window_bounds = array<i64: 128, 8>}]} {
    %cst = arith.constant 0.000000e+00 : f32
    %0 = vector.broadcast %cst : f32 to vector<128x8xf32>
    %c0 = arith.constant 0 : index
    %c0_0 = arith.constant 0 : index
    %c0_1 = arith.constant 0 : index
    %1 = vector.load %arg1[%c0, %c0_0, %c0_1] : memref<4x128x32xf32, #tpu.memory_space<vmem>>, vector<1x128x32xf32>
    %2 = vector.shape_cast %1 : vector<1x128x32xf32> to vector<128x32xf32>
    %c0_2 = arith.constant 0 : index
    %c0_3 = arith.constant 0 : index
    %c0_4 = arith.constant 0 : index
    %3 = vector.load %arg2[%c0_2, %c0_3, %c0_4] : memref<4x32x8xf32, #tpu.memory_space<vmem>>, vector<1x32x8xf32>
    %4 = vector.shape_cast %3 : vector<1x32x8xf32> to vector<32x8xf32>
    %cst_5 = arith.constant dense<0.000000e+00> : vector<128x8xf32>
    %5 = tpu.matmul %2, %4, %cst_5 {dimension_numbers = #tpu.dot_dimension_numbers<[1], [0], [0], [1], [0, 0, 1, 1], [], []>} : vector<128x32xf32>, vector<32x8xf32>, vector<128x8xf32> -> vector<128x8xf32>
    %6 = arith.addf %0, %5 : vector<128x8xf32>
    %c1 = arith.constant 1 : index
    %c0_6 = arith.constant 0 : index
    %c0_7 = arith.constant 0 : index
    %7 = vector.load %arg1[%c1, %c0_6, %c0_7] : memref<4x128x32xf32, #tpu.memory_space<vmem>>, vector<1x128x32xf32>
    %8 = vector.shape_cast %7 : vector<1x128x32xf32> to vector<128x32xf32>
    %c1_8 = arith.constant 1 : index
    %c0_9 = arith.constant 0 : index
    %c0_10 = arith.constant 0 : index
    %9 = vector.load %arg2[%c1_8, %c0_9, %c0_10] : memref<4x32x8xf32, #tpu.memory_space<vmem>>, vector<1x32x8xf32>
    %10 = vector.shape_cast %9 : vector<1x32x8xf32> to vector<32x8xf32>
    %cst_11 = arith.constant dense<0.000000e+00> : vector<128x8xf32>
    %11 = tpu.matmul %8, %10, %cst_11 {dimension_numbers = #tpu.dot_dimension_numbers<[1], [0], [0], [1], [0, 0, 1, 1], [], []>} : vector<128x32xf32>, vector<32x8xf32>, vector<128x8xf32> -> vector<128x8xf32>
    %12 = arith.addf %6, %11 : vector<128x8xf32>
    %c2 = arith.constant 2 : index
    %c0_12 = arith.constant 0 : index
    %c0_13 = arith.constant 0 : index
    %13 = vector.load %arg1[%c2, %c0_12, %c0_13] : memref<4x128x32xf32, #tpu.memory_space<vmem>>, vector<1x128x32xf32>
    %14 = vector.shape_cast %13 : vector<1x128x32xf32> to vector<128x32xf32>
    %c2_14 = arith.constant 2 : index
    %c0_15 = arith.constant 0 : index
    %c0_16 = arith.constant 0 : index
    %15 = vector.load %arg2[%c2_14, %c0_15, %c0_16] : memref<4x32x8xf32, #tpu.memory_space<vmem>>, vector<1x32x8xf32>
    %16 = vector.shape_cast %15 : vector<1x32x8xf32> to vector<32x8xf32>
    %cst_17 = arith.constant dense<0.000000e+00> : vector<128x8xf32>
    %17 = tpu.matmul %14, %16, %cst_17 {dimension_numbers = #tpu.dot_dimension_numbers<[1], [0], [0], [1], [0, 0, 1, 1], [], []>} : vector<128x32xf32>, vector<32x8xf32>, vector<128x8xf32> -> vector<128x8xf32>
    %18 = arith.addf %12, %17 : vector<128x8xf32>
    %c3 = arith.constant 3 : index
    %c0_18 = arith.constant 0 : index
    %c0_19 = arith.constant 0 : index
    %19 = vector.load %arg1[%c3, %c0_18, %c0_19] : memref<4x128x32xf32, #tpu.memory_space<vmem>>, vector<1x128x32xf32>
    %20 = vector.shape_cast %19 : vector<1x128x32xf32> to vector<128x32xf32>
    %c3_20 = arith.constant 3 : index
    %c0_21 = arith.constant 0 : index
    %c0_22 = arith.constant 0 : index
    %21 = vector.load %arg2[%c3_20, %c0_21, %c0_22] : memref<4x32x8xf32, #tpu.memory_space<vmem>>, vector<1x32x8xf32>
    %22 = vector.shape_cast %21 : vector<1x32x8xf32> to vector<32x8xf32>
    %cst_23 = arith.constant dense<0.000000e+00> : vector<128x8xf32>
    %23 = tpu.matmul %20, %22, %cst_23 {dimension_numbers = #tpu.dot_dimension_numbers<[1], [0], [0], [1], [0, 0, 1, 1], [], []>} : vector<128x32xf32>, vector<32x8xf32>, vector<128x8xf32> -> vector<128x8xf32>
    %24 = arith.addf %18, %23 : vector<128x8xf32>
    %c0_24 = arith.constant 0 : index
    %c0_25 = arith.constant 0 : index
    %25 = vector.load %arg3[%c0_24, %c0_25] : memref<1x8xf32, #tpu.memory_space<vmem>>, vector<1x8xf32>
    %26 = vector.broadcast %25 : vector<1x8xf32> to vector<128x8xf32>
    %27 = arith.addf %24, %26 : vector<128x8xf32>
    %c0_26 = arith.constant 0 : index
    %c0_27 = arith.constant 0 : index
    %28 = vector.load %arg4[%c0_26, %c0_27] : memref<128x8xf32, #tpu.memory_space<vmem>>, vector<128x8xf32>
    tpu.vector_store %arg4[%c0_26, %c0_27], %27 {strides = array<i32>} : memref<128x8xf32, #tpu.memory_space<vmem>>, vector<128x8xf32>,
    return
  }
  func.func @transform_0(%arg0: i32) -> (i32, i32, i32) {
    %c0_i32 = arith.constant 0 : i32
    %c0_i32_0 = arith.constant 0 : i32
    %c0_i32_1 = arith.constant 0 : i32
    return %c0_i32, %arg0, %c0_i32_0 : i32, i32, i32
  }
  func.func @transform_1(%arg0: i32) -> (i32, i32, i32) {
    %c0_i32 = arith.constant 0 : i32
    %c0_i32_0 = arith.constant 0 : i32
    %c0_i32_1 = arith.constant 0 : i32
    %c0_i32_2 = arith.constant 0 : i32
    return %c0_i32, %c0_i32_0, %c0_i32_1 : i32, i32, i32
  }
  func.func @transform_2(%arg0: i32) -> (i32, i32) {
    %c0_i32 = arith.constant 0 : i32
    %c0_i32_0 = arith.constant 0 : i32
    %c0_i32_1 = arith.constant 0 : i32
    return %c0_i32, %c0_i32_0 : i32, i32
  }
  func.func @transform_3(%arg0: i32) -> (i32, i32) {
    %c0_i32 = arith.constant 0 : i32
    %c0_i32_0 = arith.constant 0 : i32
    return %arg0, %c0_i32 : i32, i32
  }
}

</mosaic_0001>

<bundles_post_ra>
// kernel: tpu_custom_call.1
= control target key start
LH: loop header
LB: loop body
LE: loop exit
PB: predicated region body
PF: predicated region fallthrough
CT: control target
= control target key end

     0   :  { %s1948_s12 = smov 0   ;;  %s1950_s13 = smov 0   ;;  %s2365_s0 = inlined_call_operand.vmem [shape: f32[4,512,32], index: 0, kind: input, shape index: {}]   ;;  %s2366_s1 = inlined_call_operand.vmem [shape: f32[4,32,8], index: 1, kind: input, shape index: {}]   ;;  %s2367_s2 = inlined_call_operand.vmem [shape: f32[1,8], index: 2, kind: input, shape index: {}]   ;;  %s2368_s3 = inlined_call_operand.vmem [shape: f32[512,8], index: 3, kind: output, shape index: {}]  }
   0x1   :  { %s1952_s14 = smov 0  }
   0x2 LB: > { %s1453_s15 = sadd.s32 4294967295, %s1926_s14   ;;  %s1965_s16 = sadd.s32 1, %s1926_s14   ;;  %s1926_s14 = sphi %s1952_s14, %s2371_s14   ;;  %s1922_s13 = sphi %s1950_s13, %s2370_s13   ;;  %s1918_s12 = sphi %s1948_s12, %s2369_s12  }
   0x3   : > { %s17_s17 = ssub.s32 %s1926_s14, %s1965_s16  ;;  %s20_s18 = sadd.s32 1, %s1922_s13 }
   0x4   : > { %p18_p0 = scmp.eq.s32.totalorder %s17_s17, 0  ;;  %p27_p1 = scmp.ne.s32.totalorder %s1922_s13, %s1918_s12 }
   0x5   : > { %p28_p2 = scmp.eq.s32.totalorder %s1926_s14, 0  ;;  %p1456_p4 = scmp.ge.s32.totalorder %s1926_s14, 4 }
   0x6   : > { %s1974_s19 = scalar_select %p18_p0, %s1922_s13, %s20_s18  }
   0x7   : > { %p29_p3 = por %p28_p2, %p27_p1  ;;  %127 = sbr.rel (%p1456_p4) target bundleno = 50 (0x32), region = 24 }
   0xe   : > { %130 = sbr.rel (!%p29_p3) target bundleno = 50 (0x32), region = 28  ;;  %s132_s20 = sand.u32 (%p29_p3), 1, %s1922_s13  }
   0xf   : > { %s1591_s21 = sshll.u32 (%p29_p3), %s1926_s14, 7  ;;  %s1457_s22 = sshll.u32 (%p29_p3), %s132_s20, 9 }
  0x10   : > { %s1982_s25 = scalar_lea.vmem (%p29_p3), %s2365_s0, %s1591_s21  ;;  %s1987_s26 = scalar_lea.vmem (%p29_p3), [#allocation2], %s1457_s22 }
  0x11   : > { %v291_v0 = vld [vmem:[%s1982_s25] sm:$0xff] (%p29_p3)  ;;  %v293_v1 = vld [vmem:[%s1982_s25 + $0x8] sm:$0xff] (%p29_p3)  ;;  %v295_v2 = vld [vmem:[%s1982_s25 + $0x10] sm:$0xff] (%p29_p3) }
  0x12   : > { %292 = vst [vmem:[%s1987_s26] sm:$0xff] (%p29_p3), %v291_v0  ;;  %294 = vst [vmem:[%s1987_s26 + $0x8] sm:$0xff] (%p29_p3), %v293_v1  ;;  %v297_v3 = vld [vmem:[%s1982_s25 + $0x18] sm:$0xff] (%p29_p3)  ;;  %v299_v4 = vld [vmem:[%s1982_s25 + $0x20] sm:$0xff] (%p29_p3) }
  0x13   : > { %296 = vst [vmem:[%s1987_s26 + $0x10] sm:$0xff] (%p29_p3), %v295_v2  ;;  %v301_v5 = vld [vmem:[%s1982_s25 + $0x28] sm:$0xff] (%p29_p3)  ;;  %298 = vst [vmem:[%s1987_s26 + $0x18] sm:$0xff] (%p29_p3), %v297_v3  ;;  %v303_v6 = vld [vmem:[%s1982_s25 + $0x30] sm:$0xff] (%p29_p3) }
  0x14   : > { %300 = vst [vmem:[%s1987_s26 + $0x20] sm:$0xff] (%p29_p3), %v299_v4  ;;  %302 = vst [vmem:[%s1987_s26 + $0x28] sm:$0xff] (%p29_p3), %v301_v5  ;;  %v305_v7 = vld [vmem:[%s1982_s25 + $0x38] sm:$0xff] (%p29_p3)  ;;  %v307_v8 = vld [vmem:[%s1982_s25 + $0x40] sm:$0xff] (%p29_p3) }
  0x15   : > { %304 = vst [vmem:[%s1987_s26 + $0x30] sm:$0xff] %v303_v6  ;;  %306 = vst [vmem:[%s1987_s26 + $0x38] sm:$0xff] %v305_v7  ;;  %v309_v9 = vld [vmem:[%s1982_s25 + $0x48] sm:$0xff]  ;;  %v311_v10 = vld [vmem:[%s1982_s25 + $0x50] sm:$0xff] }
  0x16   : > { %308 = vst [vmem:[%s1987_s26 + $0x40] sm:$0xff] %v307_v8  ;;  %v313_v11 = vld [vmem:[%s1982_s25 + $0x58] sm:$0xff]  ;;  %310 = vst [vmem:[%s1987_s26 + $0x48] sm:$0xff] %v309_v9  ;;  %v315_v12 = vld [vmem:[%s1982_s25 + $0x60] sm:$0xff] }
  0x17   : > { %312 = vst [vmem:[%s1987_s26 + $0x50] sm:$0xff] %v311_v10  ;;  %314 = vst [vmem:[%s1987_s26 + $0x58] sm:$0xff] %v313_v11  ;;  %v317_v13 = vld [vmem:[%s1982_s25 + $0x68] sm:$0xff]  ;;  %v319_v14 = vld [vmem:[%s1982_s25 + $0x70] sm:$0xff] }
  0x18   : > { %316 = vst [vmem:[%s1987_s26 + $0x60] sm:$0xff] %v315_v12  ;;  %318 = vst [vmem:[%s1987_s26 + $0x68] sm:$0xff] %v317_v13  ;;  %v321_v15 = vld [vmem:[%s1982_s25 + $0x78] sm:$0xff]  ;;  %v323_v16 = vld [vmem:[%s1982_s25 + $0x200] sm:$0xff] }
  0x19   : > { %320 = vst [vmem:[%s1987_s26 + $0x70] sm:$0xff] %v319_v14  ;;  %v325_v17 = vld [vmem:[%s1982_s25 + $0x208] sm:$0xff]  ;;  %322 = vst [vmem:[%s1987_s26 + $0x78] sm:$0xff] %v321_v15  ;;  %v327_v18 = vld [vmem:[%s1982_s25 + $0x210] sm:$0xff] }
  0x1a   : > { %324 = vst [vmem:[%s1987_s26 + $0x80] sm:$0xff] %v323_v16  ;;  %326 = vst [vmem:[%s1987_s26 + $0x88] sm:$0xff] %v325_v17  ;;  %v329_v19 = vld [vmem:[%s1982_s25 + $0x218] sm:$0xff]  ;;  %v331_v20 = vld [vmem:[%s1982_s25 + $0x220] sm:$0xff] }
  0x1b   : > { %328 = vst [vmem:[%s1987_s26 + $0x90] sm:$0xff] %v327_v18  ;;  %330 = vst [vmem:[%s1987_s26 + $0x98] sm:$0xff] %v329_v19  ;;  %v333_v21 = vld [vmem:[%s1982_s25 + $0x228] sm:$0xff]  ;;  %v335_v22 = vld [vmem:[%s1982_s25 + $0x230] sm:$0xff] }
  0x1c   : > { %332 = vst [vmem:[%s1987_s26 + $0xa0] sm:$0xff] %v331_v20  ;;  %v337_v23 = vld [vmem:[%s1982_s25 + $0x238] sm:$0xff]  ;;  %334 = vst [vmem:[%s1987_s26 + $0xa8] sm:$0xff] %v333_v21  ;;  %v339_v24 = vld [vmem:[%s1982_s25 + $0x240] sm:$0xff] }
  0x1d   : > { %336 = vst [vmem:[%s1987_s26 + $0xb0] sm:$0xff] %v335_v22  ;;  %338 = vst [vmem:[%s1987_s26 + $0xb8] sm:$0xff] %v337_v23  ;;  %v341_v25 = vld [vmem:[%s1982_s25 + $0x248] sm:$0xff]  ;;  %v343_v26 = vld [vmem:[%s1982_s25 + $0x250] sm:$0xff] }
  0x1e   : > { %340 = vst [vmem:[%s1987_s26 + $0xc0] sm:$0xff] %v339_v24  ;;  %342 = vst [vmem:[%s1987_s26 + $0xc8] sm:$0xff] %v341_v25  ;;  %v345_v27 = vld [vmem:[%s1982_s25 + $0x258] sm:$0xff]  ;;  %v347_v28 = vld [vmem:[%s1982_s25 + $0x260] sm:$0xff] }
  0x1f   : > { %344 = vst [vmem:[%s1987_s26 + $0xd0] sm:$0xff] %v343_v26  ;;  %v349_v29 = vld [vmem:[%s1982_s25 + $0x268] sm:$0xff]  ;;  %346 = vst [vmem:[%s1987_s26 + $0xd8] sm:$0xff] %v345_v27  ;;  %v351_v30 = vld [vmem:[%s1982_s25 + $0x270] sm:$0xff] }
  0x20   : > { %348 = vst [vmem:[%s1987_s26 + $0xe0] sm:$0xff] %v347_v28  ;;  %350 = vst [vmem:[%s1987_s26 + $0xe8] sm:$0xff] %v349_v29  ;;  %v353_v31 = vld [vmem:[%s1982_s25 + $0x278] sm:$0xff]  ;;  %v355_v32 = vld [vmem:[%s1982_s25 + $0x400] sm:$0xff] }
  0x21   : > { %352 = vst [vmem:[%s1987_s26 + $0xf0] sm:$0xff] %v351_v30  ;;  %354 = vst [vmem:[%s1987_s26 + $0xf8] sm:$0xff] %v353_v31  ;;  %v357_v33 = vld [vmem:[%s1982_s25 + $0x408] sm:$0xff]  ;;  %v359_v34 = vld [vmem:[%s1982_s25 + $0x410] sm:$0xff] }
  0x22   : > { %356 = vst [vmem:[%s1987_s26 + $0x100] sm:$0xff] %v355_v32  ;;  %v361_v35 = vld [vmem:[%s1982_s25 + $0x418] sm:$0xff]  ;;  %358 = vst [vmem:[%s1987_s26 + $0x108] sm:$0xff] %v357_v33  ;;  %v363_v36 = vld [vmem:[%s1982_s25 + $0x420] sm:$0xff] }
  0x23   : > { %360 = vst [vmem:[%s1987_s26 + $0x110] sm:$0xff] %v359_v34  ;;  %362 = vst [vmem:[%s1987_s26 + $0x118] sm:$0xff] %v361_v35  ;;  %v365_v37 = vld [vmem:[%s1982_s25 + $0x428] sm:$0xff]  ;;  %v367_v38 = vld [vmem:[%s1982_s25 + $0x430] sm:$0xff] }
  0x24   : > { %364 = vst [vmem:[%s1987_s26 + $0x120] sm:$0xff] %v363_v36  ;;  %366 = vst [vmem:[%s1987_s26 + $0x128] sm:$0xff] %v365_v37  ;;  %v369_v39 = vld [vmem:[%s1982_s25 + $0x438] sm:$0xff]  ;;  %v371_v40 = vld [vmem:[%s1982_s25 + $0x440] sm:$0xff] }
  0x25   : > { %368 = vst [vmem:[%s1987_s26 + $0x130] sm:$0xff] %v367_v38  ;;  %v373_v41 = vld [vmem:[%s1982_s25 + $0x448] sm:$0xff]  ;;  %370 = vst [vmem:[%s1987_s26 + $0x138] sm:$0xff] %v369_v39  ;;  %v375_v42 = vld [vmem:[%s1982_s25 + $0x450] sm:$0xff] }
  0x26   : > { %372 = vst [vmem:[%s1987_s26 + $0x140] sm:$0xff] %v371_v40  ;;  %374 = vst [vmem:[%s1987_s26 + $0x148] sm:$0xff] %v373_v41  ;;  %v377_v43 = vld [vmem:[%s1982_s25 + $0x458] sm:$0xff]  ;;  %v379_v44 = vld [vmem:[%s1982_s25 + $0x460] sm:$0xff] }
  0x27   : > { %376 = vst [vmem:[%s1987_s26 + $0x150] sm:$0xff] %v375_v42  ;;  %378 = vst [vmem:[%s1987_s26 + $0x158] sm:$0xff] %v377_v43  ;;  %v381_v45 = vld [vmem:[%s1982_s25 + $0x468] sm:$0xff]  ;;  %v383_v46 = vld [vmem:[%s1982_s25 + $0x470] sm:$0xff] }
  0x28   : > { %380 = vst [vmem:[%s1987_s26 + $0x160] sm:$0xff] %v379_v44  ;;  %v385_v47 = vld [vmem:[%s1982_s25 + $0x478] sm:$0xff]  ;;  %382 = vst [vmem:[%s1987_s26 + $0x168] sm:$0xff] %v381_v45  ;;  %v387_v48 = vld [vmem:[%s1982_s25 + $0x600] sm:$0xff] }
  0x29   : > { %384 = vst [vmem:[%s1987_s26 + $0x170] sm:$0xff] %v383_v46  ;;  %386 = vst [vmem:[%s1987_s26 + $0x178] sm:$0xff] %v385_v47  ;;  %v389_v49 = vld [vmem:[%s1982_s25 + $0x608] sm:$0xff]  ;;  %v391_v50 = vld [vmem:[%s1982_s25 + $0x610] sm:$0xff] }
  0x2a   : > { %388 = vst [vmem:[%s1987_s26 + $0x180] sm:$0xff] %v387_v48  ;;  %390 = vst [vmem:[%s1987_s26 + $0x188] sm:$0xff] %v389_v49  ;;  %v393_v51 = vld [vmem:[%s1982_s25 + $0x618] sm:$0xff]  ;;  %v395_v52 = vld [vmem:[%s1982_s25 + $0x620] sm:$0xff] }
  0x2b   : > { %392 = vst [vmem:[%s1987_s26 + $0x190] sm:$0xff] %v391_v50  ;;  %v397_v53 = vld [vmem:[%s1982_s25 + $0x628] sm:$0xff]  ;;  %394 = vst [vmem:[%s1987_s26 + $0x198] sm:$0xff] %v393_v51  ;;  %v399_v54 = vld [vmem:[%s1982_s25 + $0x630] sm:$0xff] }
  0x2c   : > { %396 = vst [vmem:[%s1987_s26 + $0x1a0] sm:$0xff] %v395_v52  ;;  %398 = vst [vmem:[%s1987_s26 + $0x1a8] sm:$0xff] %v397_v53  ;;  %v401_v55 = vld [vmem:[%s1982_s25 + $0x638] sm:$0xff]  ;;  %v403_v56 = vld [vmem:[%s1982_s25 + $0x640] sm:$0xff] }
  0x2d   : > { %400 = vst [vmem:[%s1987_s26 + $0x1b0] sm:$0xff] %v399_v54  ;;  %402 = vst [vmem:[%s1987_s26 + $0x1b8] sm:$0xff] %v401_v55  ;;  %v405_v57 = vld [vmem:[%s1982_s25 + $0x648] sm:$0xff]  ;;  %v407_v58 = vld [vmem:[%s1982_s25 + $0x650] sm:$0xff] }
  0x2e   : > { %404 = vst [vmem:[%s1987_s26 + $0x1c0] sm:$0xff] %v403_v56  ;;  %v409_v59 = vld [vmem:[%s1982_s25 + $0x658] sm:$0xff]  ;;  %406 = vst [vmem:[%s1987_s26 + $0x1c8] sm:$0xff] %v405_v57  ;;  %v411_v60 = vld [vmem:[%s1982_s25 + $0x660] sm:$0xff] }
  0x2f   : > { %408 = vst [vmem:[%s1987_s26 + $0x1d0] sm:$0xff] %v407_v58  ;;  %410 = vst [vmem:[%s1987_s26 + $0x1d8] sm:$0xff] %v409_v59  ;;  %v413_v61 = vld [vmem:[%s1982_s25 + $0x668] sm:$0xff]  ;;  %v415_v62 = vld [vmem:[%s1982_s25 + $0x670] sm:$0xff] }
  0x30   : > { %412 = vst [vmem:[%s1987_s26 + $0x1e0] sm:$0xff] %v411_v60  ;;  %414 = vst [vmem:[%s1987_s26 + $0x1e8] sm:$0xff] %v413_v61  ;;  %v417_v63 = vld [vmem:[%s1982_s25 + $0x678] sm:$0xff] }
  0x31   : > { %416 = vst [vmem:[%s1987_s26 + $0x1f0] sm:$0xff] %v415_v62  ;;  %418 = vst [vmem:[%s1987_s26 + $0x1f8] sm:$0xff] %v417_v63 }
  0x32 PF: > { %p1460_p5 = scmp.ge.s32.totalorder %s1926_s14, 1  ;;  %p423_p6 = scmp.lt.s32.totalorder %s1926_s14, 5 }
  0x34   : > { %p424_p7 = pnand %p1460_p5, %p423_p6 }
  0x35   : > { %v1480_v0 = vld [vmem:[%s2366_s1 + $0x20] sm:$0xff] (!%p424_p7)  ;;  %v1481_v1 = vld [vmem:[%s2366_s1 + $0x28] sm:$0xff] (!%p424_p7)  ;;  %s430_s6 = sand.u32 (!%p424_p7), 1, %s1918_s12   ;;  %v1482_v5 = vld [vmem:[%s2366_s1 + $0x30] sm:$0xff] (!%p424_p7)  ;;  %vm502_vm0 = vcmask (!%p424_p7), 261120   ;;  %vm1374_vm1 = vcmask (!%p424_p7), 64512  }
  0x36   : > { %427 = sbr.rel (%p424_p7) target bundleno = 343 (0x157), region = 66  ;;  %v1532_v2 = vld [vmem:[%s2366_s1 + $0x40] sm:$0xff] (!%p424_p7)  ;;  %v1800_v3 = vpack.c.bf16 (!%p424_p7), %v1481_v1, %v1480_v0  ;;  %v1533_v4 = vld [vmem:[%s2366_s1 + $0x48] sm:$0xff] (!%p424_p7)  ;;  %v1483_v6 = vld [vmem:[%s2366_s1 + $0x38] sm:$0xff] (!%p424_p7)  ;;  %s1461_s18 = sshll.u32 (!%p424_p7), %s430_s6, 9 }
  0x37   : > { %v1816_v7 = vpack.c.bf16 (!%p424_p7), %v1533_v4, %v1532_v2  ;;  %v1804_v8 = vpack.c.bf16 (!%p424_p7), %v1483_v6, %v1482_v5  ;;  %v1534_v9 = vld [vmem:[%s2366_s1 + $0x50] sm:$0xff] (!%p424_p7)  ;;  %v1535_v10 = vld [vmem:[%s2366_s1 + $0x58] sm:$0xff] (!%p424_p7)  ;;  %v476_v11 = vld [vmem:[%s2366_s1] sm:$0xff] (!%p424_p7)  ;;  %s2144_s25 = scalar_lea.vmem (!%p424_p7), [#allocation2], %s1461_s18  ;;  %s1462_s18 = sshll.u32 (!%p424_p7), %s1453_s15, 4 }
  0x38   : > { %1801 = vmatprep.subr.bf16.mxu1 (!%p424_p7), %v1800_v3  ;;  %v1820_v12 = vpack.c.bf16 (!%p424_p7), %v1535_v10, %v1534_v9  ;;  %v1464_v13 = vld [vmem:[%s2144_s25 + $0x80] sm:$0xff] (!%p424_p7)  ;;  %v477_v15 = vld [vmem:[%s2366_s1 + $0x8] sm:$0xff] (!%p424_p7)  ;;  %v1466_v22 = vld [vmem:[%s2144_s25 + $0x90] sm:$0xff] (!%p424_p7)  ;;  %p455_p8 = scmp.lt.s32.totalorder (!%p424_p7), %s1462_s18, 63 }
  0x39   : > { %1817 = vmatprep.subr.bf16.mxu0 (!%p424_p7), %v1816_v7  ;;  %1803 = vmatpush3.bf16.msra.mxu1 (!%p424_p7), %v1800_v3  ;;  %v1516_v14 = vld [vmem:[%s2144_s25 + $0x100] sm:$0xff] (!%p424_p7)  ;;  %v1808_v17 = vpack.c.bf16 (!%p424_p7), %v477_v15, %v476_v11  ;;  %v1569_v18 = vld [vmem:[%s2366_s1 + $0x68] sm:$0xff] (!%p424_p7)  ;;  %v478_v23 = vld [vmem:[%s2366_s1 + $0x10] sm:$0xff] (!%p424_p7) }
  0x3a   : > { %v1568_v16 = vld [vmem:[%s2366_s1 + $0x60] sm:$0xff] (!%p424_p7)  ;;  %1819 = vmatpush3.bf16.msra.mxu0 (!%p424_p7), %v1816_v7  ;;  %1805 = vmatprep.subr.bf16.mxu1 (!%p424_p7), %v1804_v8  ;;  %v1465_v20 = vld [vmem:[%s2144_s25 + $0x88] sm:$0xff] (!%p424_p7)  ;;  %v479_v24 = vld [vmem:[%s2366_s1 + $0x18] sm:$0xff] (!%p424_p7) }
  0x3b   : > { %1821 = vmatprep.subr.bf16.mxu0 (!%p424_p7), %v1820_v12  ;;  %1680 = vmatprep.mubr.msk.f32.mxu1 (!%p424_p7), %vm502_vm0, %v1464_v13  ;;  %v1824_v19 = vpack.c.bf16 (!%p424_p7), %v1569_v18, %v1568_v16  ;;  %v1517_v21 = vld [vmem:[%s2144_s25 + $0x108] sm:$0xff] (!%p424_p7)  ;;  %v1518_v25 = vld [vmem:[%s2144_s25 + $0x110] sm:$0xff] (!%p424_p7)  ;;  %v1812_v26 = vpack.c.bf16 (!%p424_p7), %v479_v24, %v478_v23  ;;  %v1571_v28 = vld [vmem:[%s2366_s1 + $0x78] sm:$0xff] (!%p424_p7) }
  0x3c   : > { %1744 = vmatprep.mubr.msk.f32.mxu0 (!%p424_p7), %vm502_vm0, %v1516_v14  ;;  %v1570_v27 = vld [vmem:[%s2366_s1 + $0x70] sm:$0xff] (!%p424_p7)  ;;  %v1467_v29 = vld [vmem:[%s2144_s25 + $0x98] sm:$0xff] (!%p424_p7)  ;;  %v1468_v32 = vld [vmem:[%s2144_s25 + $0xa0] sm:$0xff] (!%p424_p7) }
  0x3d   : > { %1807 = vmatpush3.bf16.msra.mxu1 %v1804_v8  ;;  %v1828_v30 = vpack.c.bf16 %v1571_v28, %v1570_v27  ;;  %v1519_v31 = vld [vmem:[%s2144_s25 + $0x118] sm:$0xff]  ;;  %v1520_v33 = vld [vmem:[%s2144_s25 + $0x120] sm:$0xff]  ;;  %v1469_v34 = vld [vmem:[%s2144_s25 + $0xa8] sm:$0xff]  ;;  %s2373_s18 = smov (!%p455_p8, %s1462_s18), 63 }
  0x3e   : > { %1823 = vmatpush3.bf16.msra.mxu0 %v1820_v12  ;;  %1809 = vmatprep.subr.bf16.mxu1 %v1808_v17  ;;  %v1521_v35 = vld [vmem:[%s2144_s25 + $0x128] sm:$0xff]  ;;  %v1470_v36 = vld [vmem:[%s2144_s25 + $0xb0] sm:$0xff]  ;;  %v1471_v38 = vld [vmem:[%s2144_s25 + $0xb8] sm:$0xff]  ;;  %s1463_s20 = sshll.u32 %s2373_s18, 3 }
  0x3f   : > { %1825 = vmatprep.subr.bf16.mxu0 %v1824_v19  ;;  %v1522_v37 = vld [vmem:[%s2144_s25 + $0x130] sm:$0xff]  ;;  %v1523_v39 = vld [vmem:[%s2144_s25 + $0x138] sm:$0xff]  ;;  %v1472_v40 = vld [vmem:[%s2144_s25 + $0xc0] sm:$0xff]  ;;  %s2305_s24 = scalar_lea.vmem %s2368_s3, %s1463_s20 }
  0x40   : > { %1681 = vmatmul.mubr.msk.f32.vlgmr.msra.gmra.mrb[0].mxu1 %vm502_vm0, %v1465_v20  ;;  %v1524_v41 = vld [vmem:[%s2144_s25 + $0x140] sm:$0xff]  ;;  %v1473_v42 = vld [vmem:[%s2144_s25 + $0xc8] sm:$0xff]  ;;  %v1474_v44 = vld [vmem:[%s2144_s25 + $0xd0] sm:$0xff] }
  0x41   : > { %1745 = vmatmul.mubr.msk.f32.vlgmr.msra.gmra.mrb[0].mxu0 %vm502_vm0, %v1517_v21  ;;  %1811 = vmatpush3.bf16.msra.mxu1 %v1808_v17  ;;  %v1525_v43 = vld [vmem:[%s2144_s25 + $0x148] sm:$0xff]  ;;  %v1526_v45 = vld [vmem:[%s2144_s25 + $0x150] sm:$0xff]  ;;  %v1475_v46 = vld [vmem:[%s2144_s25 + $0xd8] sm:$0xff] }
  0x42   : > { %1827 = vmatpush3.bf16.msra.mxu0 %v1824_v19  ;;  %1683 = vmatprep.mubr.msk.f32.mxu1 %vm502_vm0, %v1466_v22  ;;  %v1527_v47 = vld [vmem:[%s2144_s25 + $0x158] sm:$0xff]  ;;  %v1476_v48 = vld [vmem:[%s2144_s25 + $0xe0] sm:$0xff]  ;;  %v1477_v50 = vld [vmem:[%s2144_s25 + $0xe8] sm:$0xff] }
  0x43   : > { %1747 = vmatprep.mubr.msk.f32.mxu0 %vm502_vm0, %v1518_v25  ;;  %1813 = vmatprep.subr.bf16.mxu1 %v1812_v26  ;;  %v1528_v49 = vld [vmem:[%s2144_s25 + $0x160] sm:$0xff]  ;;  %v1529_v51 = vld [vmem:[%s2144_s25 + $0x168] sm:$0xff]  ;;  %v1478_v52 = vld [vmem:[%s2144_s25 + $0xf0] sm:$0xff] }
  0x44   : > { %1684 = vmatmul.mubr.msk.f32.gmra.mrb[2].mxu1 %vm502_vm0, %v1467_v29  ;;  %1829 = vmatprep.subr.bf16.mxu0 %v1828_v30  ;;  %v1530_v53 = vld [vmem:[%s2144_s25 + $0x170] sm:$0xff]  ;;  %v1479_v54 = vld [vmem:[%s2144_s25 + $0xf8] sm:$0xff]  ;;  %v460_v56 = vld [vmem:[%s2144_s25] sm:$0xff] }
  0x45   : > { %1748 = vmatmul.mubr.msk.f32.gmra.mrb[2].mxu0 %vm502_vm0, %v1519_v31  ;;  %1686 = vmatprep.mubr.msk.f32.mxu1 %vm502_vm0, %v1468_v32  ;;  %v1531_v55 = vld [vmem:[%s2144_s25 + $0x178] sm:$0xff]  ;;  %v1552_v57 = vld [vmem:[%s2144_s25 + $0x180] sm:$0xff]  ;;  %v461_v58 = vld [vmem:[%s2144_s25 + $0x8] sm:$0xff] }
  0x46   : > { %1750 = vmatprep.mubr.msk.f32.mxu0 %vm502_vm0, %v1520_v33  ;;  %1815 = vmatpush3.bf16.msra.mxu1 %v1812_v26  ;;  %v1553_v59 = vld [vmem:[%s2144_s25 + $0x188] sm:$0xff]  ;;  %v462_v60 = vld [vmem:[%s2144_s25 + $0x10] sm:$0xff]  ;;  %v463_v62 = vld [vmem:[%s2144_s25 + $0x18] sm:$0xff] }
  0x47   : > { %1831 = vmatpush3.bf16.msra.mxu0 %v1828_v30  ;;  %v1554_v61 = vld [vmem:[%s2144_s25 + $0x190] sm:$0xff]  ;;  %v1555_v63 = vld [vmem:[%s2144_s25 + $0x198] sm:$0xff]  ;;  %v464_v0 = vld [vmem:[%s2144_s25 + $0x20] sm:$0xff] }
  0x48   : > { %1687 = vmatmul.mubr.msk.f32.gmra.mrb[4].mxu1 %vm502_vm0, %v1469_v34  ;;  %v1556_v1 = vld [vmem:[%s2144_s25 + $0x1a0] sm:$0xff]  ;;  %v465_v2 = vld [vmem:[%s2144_s25 + $0x28] sm:$0xff]  ;;  %v466_v4 = vld [vmem:[%s2144_s25 + $0x30] sm:$0xff] }
  0x49   : > { %1751 = vmatmul.mubr.msk.f32.gmra.mrb[4].mxu0 %vm502_vm0, %v1521_v35  ;;  %1689 = vmatprep.mubr.msk.f32.mxu1 %vm502_vm0, %v1470_v36  ;;  %v1557_v3 = vld [vmem:[%s2144_s25 + $0x1a8] sm:$0xff]  ;;  %v1558_v5 = vld [vmem:[%s2144_s25 + $0x1b0] sm:$0xff]  ;;  %v467_v6 = vld [vmem:[%s2144_s25 + $0x38] sm:$0xff] }
  0x4a   : > { %1753 = vmatprep.mubr.msk.f32.mxu0 %vm502_vm0, %v1522_v37  ;;  %v1559_v7 = vld [vmem:[%s2144_s25 + $0x1b8] sm:$0xff]  ;;  %v468_v8 = vld [vmem:[%s2144_s25 + $0x40] sm:$0xff]  ;;  %v469_v10 = vld [vmem:[%s2144_s25 + $0x48] sm:$0xff] }
  0x4b   : > { %v1560_v9 = vld [vmem:[%s2144_s25 + $0x1c0] sm:$0xff]  ;;  %v1561_v11 = vld [vmem:[%s2144_s25 + $0x1c8] sm:$0xff]  ;;  %v470_v12 = vld [vmem:[%s2144_s25 + $0x50] sm:$0xff] }
  0x4c   : > { %1690 = vmatmul.mubr.msk.f32.gmra.mrb[6].mxu1 %vm502_vm0, %v1471_v38  ;;  %v1562_v13 = vld [vmem:[%s2144_s25 + $0x1d0] sm:$0xff]  ;;  %v471_v14 = vld [vmem:[%s2144_s25 + $0x58] sm:$0xff]  ;;  %v472_v16 = vld [vmem:[%s2144_s25 + $0x60] sm:$0xff] }
  0x4d   : > { %1754 = vmatmul.mubr.msk.f32.gmra.mrb[6].mxu0 %vm502_vm0, %v1523_v39  ;;  %1692 = vmatprep.mubr.msk.f32.mxu1 %vm502_vm0, %v1472_v40  ;;  %v1563_v15 = vld [vmem:[%s2144_s25 + $0x1d8] sm:$0xff]  ;;  %v1564_v17 = vld [vmem:[%s2144_s25 + $0x1e0] sm:$0xff]  ;;  %v473_v18 = vld [vmem:[%s2144_s25 + $0x68] sm:$0xff] }
  0x4e   : > { %1756 = vmatprep.mubr.msk.f32.mxu0 %vm502_vm0, %v1524_v41  ;;  %v1565_v19 = vld [vmem:[%s2144_s25 + $0x1e8] sm:$0xff]  ;;  %v474_v20 = vld [vmem:[%s2144_s25 + $0x70] sm:$0xff]  ;;  %v475_v22 = vld [vmem:[%s2144_s25 + $0x78] sm:$0xff] }
  0x4f   : > { %v1566_v21 = vld [vmem:[%s2144_s25 + $0x1f0] sm:$0xff]  ;;  %v1567_v23 = vld [vmem:[%s2144_s25 + $0x1f8] sm:$0xff]  ;;  %v2300_v26 = vld [vmem:[%s2367_s2] ss:$0 sm:$0xff] }
  0x50   : > { %1693 = vmatmul.mubr.msk.f32.gmra.mrb[8].mxu1 %vm502_vm0, %v1473_v42 }
  0x51   : > { %1757 = vmatmul.mubr.msk.f32.gmra.mrb[8].mxu0 %vm502_vm0, %v1525_v43  ;;  %1695 = vmatprep.mubr.msk.f32.mxu1 %vm502_vm0, %v1474_v44 }
  0x52   : > { %1759 = vmatprep.mubr.msk.f32.mxu0 %vm502_vm0, %v1526_v45 }
  0x54   : > { %1696 = vmatmul.mubr.msk.f32.gmra.mrb[10].mxu1 %vm502_vm0, %v1475_v46 }
  0x55   : > { %1760 = vmatmul.mubr.msk.f32.gmra.mrb[10].mxu0 %vm502_vm0, %v1527_v47  ;;  %1698 = vmatprep.mubr.msk.f32.mxu1 %vm502_vm0, %v1476_v48 }
  0x56   : > { %1762 = vmatprep.mubr.msk.f32.mxu0 %vm502_vm0, %v1528_v49 }
  0x58   : > { %1699 = vmatmul.mubr.msk.f32.gmra.mrb[12].mxu1 %vm502_vm0, %v1477_v50 }
  0x59   : > { %1763 = vmatmul.mubr.msk.f32.gmra.mrb[12].mxu0 %vm502_vm0, %v1529_v51  ;;  %1701 = vmatprep.mubr.msk.f32.mxu1 %vm502_vm0, %v1478_v52 }
  0x5a   : > { %1765 = vmatprep.mubr.msk.f32.mxu0 %vm502_vm0, %v1530_v53 }
  0x5c   : > { %1702 = vmatmul.mubr.msk.f32.gmra.mrb[14].mxu1 %vm502_vm0, %v1479_v54 }
  0x5d   : > { %1766 = vmatmul.mubr.msk.f32.gmra.mrb[14].mxu0 %vm502_vm0, %v1531_v55  ;;  %1712 = vmatprep.mubr.msk.f32.mxu1 %vm502_vm0, %v460_v56 }
  0x5e   : > { %1776 = vmatprep.mubr.msk.f32.mxu0 %vm502_vm0, %v1552_v57 }
  0x60   : > { %1713 = vmatmul.mubr.msk.f32.vlgmr.msra.gmra.mrb[0].mxu1 %vm502_vm0, %v461_v58 }
  0x61   : > { %1777 = vmatmul.mubr.msk.f32.vlgmr.msra.gmra.mrb[0].mxu0 %vm502_vm0, %v1553_v59  ;;  %1715 = vmatprep.mubr.msk.f32.mxu1 %vm502_vm0, %v462_v60 }
  0x62   : > { %1779 = vmatprep.mubr.msk.f32.mxu0 %vm502_vm0, %v1554_v61 }
  0x64   : > { %1716 = vmatmul.mubr.msk.f32.gmra.mrb[2].mxu1 %vm502_vm0, %v463_v62 }
  0x65   : > { %1780 = vmatmul.mubr.msk.f32.gmra.mrb[2].mxu0 %vm502_vm0, %v1555_v63  ;;  %1718 = vmatprep.mubr.msk.f32.mxu1 %vm502_vm0, %v464_v0 }
  0x66   : > { %1782 = vmatprep.mubr.msk.f32.mxu0 %vm502_vm0, %v1556_v1 }
  0x68   : > { %1719 = vmatmul.mubr.msk.f32.gmra.mrb[4].mxu1 %vm502_vm0, %v465_v2 }
  0x69   : > { %1783 = vmatmul.mubr.msk.f32.gmra.mrb[4].mxu0 %vm502_vm0, %v1557_v3  ;;  %1721 = vmatprep.mubr.msk.f32.mxu1 %vm502_vm0, %v466_v4 }
  0x6a   : > { %1785 = vmatprep.mubr.msk.f32.mxu0 %vm502_vm0, %v1558_v5 }
  0x6c   : > { %1722 = vmatmul.mubr.msk.f32.gmra.mrb[6].mxu1 %vm502_vm0, %v467_v6 }
  0x6d   : > { %1786 = vmatmul.mubr.msk.f32.gmra.mrb[6].mxu0 %vm502_vm0, %v1559_v7  ;;  %1724 = vmatprep.mubr.msk.f32.mxu1 %vm502_vm0, %v468_v8 }
  0x6e   : > { %1788 = vmatprep.mubr.msk.f32.mxu0 %vm502_vm0, %v1560_v9 }
  0x70   : > { %1725 = vmatmul.mubr.msk.f32.gmra.mrb[8].mxu1 %vm502_vm0, %v469_v10 }
  0x71   : > { %1789 = vmatmul.mubr.msk.f32.gmra.mrb[8].mxu0 %vm502_vm0, %v1561_v11  ;;  %1727 = vmatprep.mubr.msk.f32.mxu1 %vm502_vm0, %v470_v12 }
  0x72   : > { %1791 = vmatprep.mubr.msk.f32.mxu0 %vm502_vm0, %v1562_v13 }
  0x74   : > { %1728 = vmatmul.mubr.msk.f32.gmra.mrb[10].mxu1 %vm502_vm0, %v471_v14 }
  0x75   : > { %1792 = vmatmul.mubr.msk.f32.gmra.mrb[10].mxu0 %vm502_vm0, %v1563_v15  ;;  %1730 = vmatprep.mubr.msk.f32.mxu1 %vm502_vm0, %v472_v16 }
  0x76   : > { %1794 = vmatprep.mubr.msk.f32.mxu0 %vm502_vm0, %v1564_v17 }
  0x78   : > { %1731 = vmatmul.mubr.msk.f32.gmra.mrb[12].mxu1 %vm502_vm0, %v473_v18 }
  0x79   : > { %1795 = vmatmul.mubr.msk.f32.gmra.mrb[12].mxu0 %vm502_vm0, %v1565_v19  ;;  %1733 = vmatprep.mubr.msk.f32.mxu1 %vm502_vm0, %v474_v20 }
  0x7a   : > { %1797 = vmatprep.mubr.msk.f32.mxu0 %vm502_vm0, %v1566_v21 }
  0x7c   : > { %1734 = vmatmul.mubr.msk.f32.gmra.mrb[14].mxu1 %vm502_vm0, %v475_v22 }
  0x7d   : > { %1798 = vmatmul.mubr.msk.f32.gmra.mrb[14].mxu0 %vm502_vm0, %v1567_v23 }
 0x133   : > { %v1714_v24 = vpop.f32.mrb[0].mxu1 }
 0x134   : > { %v1778_v25 = vpop.f32.mrb[0].mxu0  ;;  %v810_v27 = vpop.f32.mrb[1].mxu1 }
 0x135   : > { %v1832_v28 = vadd.f32 %v1778_v25, %v1714_v24  ;;  %v1256_v29 = vpop.f32.mrb[1].mxu0 }
 0x136   : > { %v1833_v30 = vadd.f32 %v1256_v29, %v810_v27 }
 0x137   : > { %v1359_v31 = vadd.f32 %v1832_v28, %v2300_v26  ;;  %v1717_v32 = vpop.f32.mrb[2].mxu1 }
 0x138   : > { %v1358_v33 = vadd.f32 %v1833_v30, %v2300_v26  ;;  %v1781_v34 = vpop.f32.mrb[2].mxu0  ;;  %v820_v35 = vpop.f32.mrb[3].mxu1 }
 0x139   : > { %1376 = vst.msk [vmem:[%s2305_s24 + $0x8] sm:$0xff] %vm1374_vm1, %v1359_v31  ;;  %v1834_v36 = vadd.f32 %v1781_v34, %v1717_v32  ;;  %v1266_v37 = vpop.f32.mrb[3].mxu0 }
 0x13a   : > { %1375 = vst.msk [vmem:[%s2305_s24] sm:$0xff] %vm1374_vm1, %v1358_v33  ;;  %v1835_v38 = vadd.f32 %v1266_v37, %v820_v35 }
 0x13b   : > { %v1361_v39 = vadd.f32 %v1834_v36, %v2300_v26  ;;  %v1720_v40 = vpop.f32.mrb[4].mxu1 }
 0x13c   : > { %v1360_v41 = vadd.f32 %v1835_v38, %v2300_v26  ;;  %v1784_v42 = vpop.f32.mrb[4].mxu0  ;;  %v830_v43 = vpop.f32.mrb[5].mxu1 }
 0x13d   : > { %1378 = vst.msk [vmem:[%s2305_s24 + $0x18] sm:$0xff] %vm1374_vm1, %v1361_v39  ;;  %v1836_v44 = vadd.f32 %v1784_v42, %v1720_v40  ;;  %v1276_v45 = vpop.f32.mrb[5].mxu0 }
 0x13e   : > { %1377 = vst.msk [vmem:[%s2305_s24 + $0x10] sm:$0xff] %vm1374_vm1, %v1360_v41  ;;  %v1837_v46 = vadd.f32 %v1276_v45, %v830_v43 }
 0x13f   : > { %v1363_v47 = vadd.f32 %v1836_v44, %v2300_v26  ;;  %v1723_v48 = vpop.f32.mrb[6].mxu1 }
 0x140   : > { %v1362_v49 = vadd.f32 %v1837_v46, %v2300_v26  ;;  %v1787_v50 = vpop.f32.mrb[6].mxu0  ;;  %v840_v51 = vpop.f32.mrb[7].mxu1 }
 0x141   : > { %1380 = vst.msk [vmem:[%s2305_s24 + $0x28] sm:$0xff] %vm1374_vm1, %v1363_v47  ;;  %v1838_v52 = vadd.f32 %v1787_v50, %v1723_v48  ;;  %v1286_v53 = vpop.f32.mrb[7].mxu0 }
 0x142   : > { %1379 = vst.msk [vmem:[%s2305_s24 + $0x20] sm:$0xff] %vm1374_vm1, %v1362_v49  ;;  %v1839_v54 = vadd.f32 %v1286_v53, %v840_v51 }
 0x143   : > { %v1365_v55 = vadd.f32 %v1838_v52, %v2300_v26  ;;  %v1726_v56 = vpop.f32.mrb[8].mxu1 }
 0x144   : > { %v1364_v57 = vadd.f32 %v1839_v54, %v2300_v26  ;;  %v1790_v58 = vpop.f32.mrb[8].mxu0  ;;  %v850_v59 = vpop.f32.mrb[9].mxu1 }
 0x145   : > { %1382 = vst.msk [vmem:[%s2305_s24 + $0x38] sm:$0xff] %vm1374_vm1, %v1365_v55  ;;  %v1840_v60 = vadd.f32 %v1790_v58, %v1726_v56  ;;  %v1296_v61 = vpop.f32.mrb[9].mxu0 }
 0x146   : > { %1381 = vst.msk [vmem:[%s2305_s24 + $0x30] sm:$0xff] %vm1374_vm1, %v1364_v57  ;;  %v1841_v62 = vadd.f32 %v1296_v61, %v850_v59 }
 0x147   : > { %v1367_v63 = vadd.f32 %v1840_v60, %v2300_v26  ;;  %v1729_v0 = vpop.f32.mrb[10].mxu1 }
 0x148   : > { %v1366_v1 = vadd.f32 %v1841_v62, %v2300_v26  ;;  %v1793_v2 = vpop.f32.mrb[10].mxu0  ;;  %v860_v3 = vpop.f32.mrb[11].mxu1 }
 0x149   : > { %1384 = vst.msk [vmem:[%s2305_s24 + $0x48] sm:$0xff] %vm1374_vm1, %v1367_v63  ;;  %v1842_v4 = vadd.f32 %v1793_v2, %v1729_v0  ;;  %v1306_v5 = vpop.f32.mrb[11].mxu0 }
 0x14a   : > { %1383 = vst.msk [vmem:[%s2305_s24 + $0x40] sm:$0xff] %vm1374_vm1, %v1366_v1  ;;  %v1843_v6 = vadd.f32 %v1306_v5, %v860_v3 }
 0x14b   : > { %v1369_v7 = vadd.f32 %v1842_v4, %v2300_v26  ;;  %v1732_v8 = vpop.f32.mrb[12].mxu1 }
 0x14c   : > { %v1368_v9 = vadd.f32 %v1843_v6, %v2300_v26  ;;  %v1796_v10 = vpop.f32.mrb[12].mxu0  ;;  %v870_v11 = vpop.f32.mrb[13].mxu1 }
 0x14d   : > { %1386 = vst.msk [vmem:[%s2305_s24 + $0x58] sm:$0xff] %vm1374_vm1, %v1369_v7  ;;  %v1844_v12 = vadd.f32 %v1796_v10, %v1732_v8  ;;  %v1316_v13 = vpop.f32.mrb[13].mxu0 }
 0x14e   : > { %1385 = vst.msk [vmem:[%s2305_s24 + $0x50] sm:$0xff] %vm1374_vm1, %v1368_v9  ;;  %v1845_v14 = vadd.f32 %v1316_v13, %v870_v11 }
 0x14f   : > { %v1371_v15 = vadd.f32 %v1844_v12, %v2300_v26  ;;  %v1735_v16 = vpop.f32.mrb[14].mxu1 }
 0x150   : > { %v1370_v17 = vadd.f32 %v1845_v14, %v2300_v26  ;;  %v1799_v18 = vpop.f32.mrb[14].mxu0  ;;  %v880_v19 = vpop.f32.mrb[15].mxu1 }
 0x151   : > { %1388 = vst.msk [vmem:[%s2305_s24 + $0x68] sm:$0xff] %vm1374_vm1, %v1371_v15  ;;  %v1846_v20 = vadd.f32 %v1799_v18, %v1735_v16  ;;  %v1326_v21 = vpop.f32.mrb[15].mxu0 }
 0x152   : > { %1387 = vst.msk [vmem:[%s2305_s24 + $0x60] sm:$0xff] %vm1374_vm1, %v1370_v17  ;;  %v1847_v22 = vadd.f32 %v1326_v21, %v880_v19 }
 0x153   : > { %v1373_v23 = vadd.f32 %v1846_v20, %v2300_v26 }
 0x154   : > { %v1372_v24 = vadd.f32 %v1847_v22, %v2300_v26 }
 0x155   : > { %1390 = vst.msk [vmem:[%s2305_s24 + $0x78] sm:$0xff] %vm1374_vm1, %v1373_v23 }
 0x156   : > { %1389 = vst.msk [vmem:[%s2305_s24 + $0x70] sm:$0xff] %vm1374_vm1, %v1372_v24 }
 0x157 PF: > { %p10_p9 = scmp.ge.s32.totalorder %s1965_s16, 6   ;;  %s2369_s12 = smov %s1922_s13 }
 0x158   : > { %s2370_s13 = smov %s1974_s19  ;;  %s2371_s14 = smov %s1965_s16 }
 0x159   :  { %12 = sbr.rel (!%p10_p9) target bundleno = 2 (0x2), region = 111 }

</bundles_post_ra>
